<compile_context>
chip_gen: v7x
topology: tpu7x:2x2x1
jax: 0.10.0
libtpu: 0.0.40
codegen_flags: <defaults>
</compile_context>

<pallas_src>
import functools
import math

import jax
import jax.numpy as jnp
from jax.experimental import pallas as pl
from jax.experimental.pallas import tpu as pltpu

EPSILON = 1e-40  # PyTorch constant (subnormal in f32)
# The TPU VPU flushes f32 subnormals to zero, so a 1e-40 clamp floor would become 0
# and inputs <= 0 would yield log(0) = -inf (divergence from PyTorch). Use the
# smallest *normal* f32 instead; this only differs from PyTorch for inputs below
# ~1.18e-38, where PyTorch itself is already deep in a degenerate regime.
CLAMP_MIN = float(jnp.finfo(jnp.float32).tiny)

LANES = 512          # lane-dense slab width (multiple of 128)
MAX_TILE_ROWS = 256  # (256, 512) f32 block = 512 KiB per input


def _round_up(x, m):
    return ((x + m - 1) // m) * m


def _dloss_kernel(real_ref, gen_ref, out_ref, acc_ref, *,
                  label_smoothing, n_valid, tile_rows, lanes):
    i = pl.program_id(0)

    @pl.when(i == 0)
    def _init():
        acc_ref[...] = jnp.zeros_like(acc_ref)

    real = real_ref[...].astype(jnp.float32)
    gen = gen_ref[...].astype(jnp.float32)

    p_real = jnp.clip(real, CLAMP_MIN, 1.0)
    p_gen = jnp.clip(1.0 - gen, CLAMP_MIN, 1.0)

    if label_smoothing:
        p_fake = jnp.clip(1.0 - real, CLAMP_MIN, 1.0)
        # 0.9*(-log p_real) + 0.1*(-log p_fake) + (-log p_gen)
        loss = -(0.9 * jnp.log(p_real) + 0.1 * jnp.log(p_fake) + jnp.log(p_gen))
    else:
        # Fused: -log(p_real) - log(p_gen) == -log(p_real * p_gen)  (one EUP op saved)
        loss = -jnp.log(p_real * p_gen)

    # Mask out padded elements (flat index >= n_valid).
    row_ids = jax.lax.broadcasted_iota(jnp.int32, (tile_rows, lanes), 0)
    col_ids = jax.lax.broadcasted_iota(jnp.int32, (tile_rows, lanes), 1)
    flat_idx = (i * tile_rows + row_ids) * lanes + col_ids
    loss = jnp.where(flat_idx < n_valid, loss, 0.0)

    # Vector (VPU) accumulation; single cross-lane reduce at the end.
    acc_ref[...] += loss

    @pl.when(i == pl.num_programs(0) - 1)
    def _finalize():
        out_ref[0, 0] = jnp.sum(acc_ref[...]) / jnp.float32(n_valid)


def dloss(logits_real, logits_gen, *, label_smoothing=False):
    """Pallas implementation of DLoss.forward. Returns a scalar f32."""
    assert logits_real.shape == logits_gen.shape, "shapes must match"

    n = int(math.prod(logits_real.shape)) if logits_real.ndim else 1
    assert n > 0, "empty input"

    rows = pl.cdiv(n, LANES)
    tile_rows = min(MAX_TILE_ROWS, _round_up(rows, 8))
    rows_padded = _round_up(rows, tile_rows)
    total_padded = rows_padded * LANES
    n_tiles = rows_padded // tile_rows

    def to_slab(x):
        flat = x.reshape(-1)
        pad = total_padded - n
        if pad:
            flat = jnp.concatenate(
                [flat, jnp.full((pad,), 0.5, dtype=flat.dtype)])
        return flat.reshape(rows_padded, LANES)

    # NOTE: no .astype(f32) here — the kernel upcasts the VMEM tile.
    r2 = to_slab(logits_real)
    g2 = to_slab(logits_gen)

    kernel = functools.partial(
        _dloss_kernel,
        label_smoothing=bool(label_smoothing),
        n_valid=n,
        tile_rows=tile_rows,
        lanes=LANES,
    )

    # VMEM budget: 2 inputs x 2 pipeline buffers + f32 accumulator (+ headroom),
    # clamped to a range that is safe on v5e / v6e / v7x.
    in_bytes = tile_rows * LANES * (r2.dtype.itemsize + g2.dtype.itemsize)
    acc_bytes = tile_rows * LANES * 4
    vmem_limit = int(min(96 << 20, max(8 << 20, 2 * in_bytes + acc_bytes + (2 << 20))))

    out = pl.pallas_call(
        kernel,
        out_shape=jax.ShapeDtypeStruct((1, 1), jnp.float32),
        grid=(n_tiles,),
        in_specs=[
            pl.BlockSpec((tile_rows, LANES), lambda i: (i, 0)),
            pl.BlockSpec((tile_rows, LANES), lambda i: (i, 0)),
        ],
        out_specs=pl.BlockSpec(memory_space=pltpu.SMEM),
        scratch_shapes=[pltpu.VMEM((tile_rows, LANES), jnp.float32)],
        compiler_params=pltpu.CompilerParams(
            dimension_semantics=("arbitrary",),
            vmem_limit_bytes=vmem_limit,
        ),
    )(r2, g2)
    return out[0, 0]


def dloss_ref(logits_real, logits_gen, *, label_smoothing=False):
    """Pure-JAX reference mirroring the PyTorch code (same clamp floor)."""
    real = jnp.clip(logits_real.astype(jnp.float32), CLAMP_MIN, 1.0)
    d_loss_real = -jnp.log(real)
    if label_smoothing:
        p_fake = jnp.clip(1.0 - logits_real.astype(jnp.float32), CLAMP_MIN, 1.0)
        d_loss_real = 0.9 * d_loss_real + 0.1 * (-jnp.log(p_fake))
    p_gen = jnp.clip(1.0 - logits_gen.astype(jnp.float32), CLAMP_MIN, 1.0)
    d_loss_gen = -jnp.log(p_gen)
    return jnp.mean(d_loss_real + d_loss_gen)


if __name__ == "__main__":
    key = jax.random.PRNGKey(0)

    # C-RNN-GAN discriminator emits per-timestep sigmoid outputs: (batch, seq, 1).
    test_cases = [
        # (shape, dtype)  -- small canonical shape, plus a multi-tile shape that
        # exercises padding/masking and cross-tile accumulation, plus a bf16 case
        # exercising the in-kernel upcast.
        ((2, 8, 1), jnp.float32),
        ((5, 30000, 1), jnp.float32),
        ((3, 700, 1), jnp.bfloat16),
    ]

    for shape, dtype in test_cases:
        key, k_real, k_gen = jax.random.split(key, 3)
        logits_real = jax.random.uniform(k_real, shape, dtype=jnp.float32,
                                         minval=0.05, maxval=0.95).astype(dtype)
        logits_gen = jax.random.uniform(k_gen, shape, dtype=jnp.float32,
                                        minval=0.05, maxval=0.95).astype(dtype)

        for smoothing in (False, True):
            out = jax.block_until_ready(
                dloss(logits_real, logits_gen, label_smoothing=smoothing))
            ref = jax.block_until_ready(
                dloss_ref(logits_real, logits_gen, label_smoothing=smoothing))
            assert jnp.allclose(out, ref, rtol=1e-5, atol=1e-5), (
                shape, dtype, smoothing, out, ref)

    print("KERNEL_OK")
</pallas_src>

<mosaic_0001>
module attributes {stable_mosaic.version = 11 : i64} {
  func.func @_dloss_kernel(%arg0: i32, %arg1: memref<8x512xf32, #tpu.memory_space<vmem>>, %arg2: memref<8x512xf32, #tpu.memory_space<vmem>>, %arg3: memref<1x1xf32, #tpu.memory_space<smem>>, %arg4: memref<8x512xf32, #tpu.memory_space<vmem>>) attributes {dimension_semantics = [#tpu.dimension_semantics<arbitrary>], iteration_bounds = array<i64: 1>, scalar_prefetch = 0 : i64, scratch_operands = 1 : i64, tpu.core_type = #tpu.core_type<tc>, window_params = [{transform_indices = @transform_0, window_bounds = array<i64: 8, 512>}, {transform_indices = @transform_1, window_bounds = array<i64: 8, 512>}, {transform_indices = @transform_2, window_bounds = array<i64: 1, 1>}]} {
    %c0_i32 = arith.constant 0 : i32
    %0 = arith.cmpi eq, %arg0, %c0_i32 : i32
    %1 = arith.extui %0 : i1 to i32
    %c0_i32_0 = arith.constant 0 : i32
    %2 = arith.cmpi ne, %1, %c0_i32_0 : i32
    scf.if %2 {
      %cst_16 = arith.constant 0.000000e+00 : f32
      %37 = vector.broadcast %cst_16 : f32 to vector<8x512xf32>
      %c0_17 = arith.constant 0 : index
      %c0_18 = arith.constant 0 : index
      %38 = vector.load %arg4[%c0_17, %c0_18] : memref<8x512xf32, #tpu.memory_space<vmem>>, vector<8x512xf32>
      tpu.vector_store %arg4[%c0_17, %c0_18], %37 {strides = array<i32>} : memref<8x512xf32, #tpu.memory_space<vmem>>, vector<8x512xf32>,
    } else {
    }
    %c0 = arith.constant 0 : index
    %c0_1 = arith.constant 0 : index
    %3 = vector.load %arg1[%c0, %c0_1] : memref<8x512xf32, #tpu.memory_space<vmem>>, vector<8x512xf32>
    %c0_2 = arith.constant 0 : index
    %c0_3 = arith.constant 0 : index
    %4 = vector.load %arg2[%c0_2, %c0_3] : memref<8x512xf32, #tpu.memory_space<vmem>>, vector<8x512xf32>
    %cst = arith.constant 1.17549435E-38 : f32
    %cst_4 = arith.constant 1.000000e+00 : f32
    %5 = vector.broadcast %cst : f32 to vector<8x512xf32>
    %6 = arith.maximumf %5, %3 : vector<8x512xf32>
    %7 = vector.broadcast %cst_4 : f32 to vector<8x512xf32>
    %8 = arith.minimumf %7, %6 : vector<8x512xf32>
    %cst_5 = arith.constant 1.000000e+00 : f32
    %9 = vector.broadcast %cst_5 : f32 to vector<8x512xf32>
    %10 = arith.subf %9, %4 : vector<8x512xf32>
    %cst_6 = arith.constant 1.17549435E-38 : f32
    %cst_7 = arith.constant 1.000000e+00 : f32
    %11 = vector.broadcast %cst_6 : f32 to vector<8x512xf32>
    %12 = arith.maximumf %11, %10 : vector<8x512xf32>
    %13 = vector.broadcast %cst_7 : f32 to vector<8x512xf32>
    %14 = arith.minimumf %13, %12 : vector<8x512xf32>
    %15 = arith.mulf %8, %14 : vector<8x512xf32>
    %16 = math.log %15 : vector<8x512xf32>
    %cst_8 = arith.constant 0.000000e+00 : f32
    %17 = vector.broadcast %cst_8 : f32 to vector<8x512xf32>
    %18 = arith.subf %17, %16 : vector<8x512xf32>
    %19 = tpu.iota {dimensions = array<i32: 0>} : vector<8x512xi32>
    %20 = tpu.iota {dimensions = array<i32: 1>} : vector<8x512xi32>
    %c8_i32 = arith.constant 8 : i32
    %21 = arith.muli %arg0, %c8_i32 : i32
    %22 = vector.broadcast %21 : i32 to vector<8x512xi32>
    %23 = arith.addi %22, %19 : vector<8x512xi32>
    %c512_i32 = arith.constant 512 : i32
    %24 = vector.broadcast %c512_i32 : i32 to vector<8x512xi32>
    %25 = arith.muli %23, %24 : vector<8x512xi32>
    %26 = arith.addi %25, %20 : vector<8x512xi32>
    %c16_i32 = arith.constant 16 : i32
    %27 = vector.broadcast %c16_i32 : i32 to vector<8x512xi32>
    %28 = arith.cmpi slt, %26, %27 : vector<8x512xi32>
    %cst_9 = arith.constant 0.000000e+00 : f32
    %29 = vector.broadcast %cst_9 : f32 to vector<8x512xf32>
    %30 = arith.select %28, %18, %29 : vector<8x512xi1>, vector<8x512xf32>
    %c0_10 = arith.constant 0 : index
    %c0_11 = arith.constant 0 : index
    %31 = vector.load %arg4[%c0_10, %c0_11] : memref<8x512xf32, #tpu.memory_space<vmem>>, vector<8x512xf32>
    %32 = arith.addf %31, %30 : vector<8x512xf32>
    %c0_12 = arith.constant 0 : index
    %c0_13 = arith.constant 0 : index
    %33 = vector.load %arg4[%c0_12, %c0_13] : memref<8x512xf32, #tpu.memory_space<vmem>>, vector<8x512xf32>
    tpu.vector_store %arg4[%c0_12, %c0_13], %32 {strides = array<i32>} : memref<8x512xf32, #tpu.memory_space<vmem>>, vector<8x512xf32>,
    %c0_i32_14 = arith.constant 0 : i32
    %34 = arith.cmpi eq, %arg0, %c0_i32_14 : i32
    %35 = arith.extui %34 : i1 to i32
    %c0_i32_15 = arith.constant 0 : i32
    %36 = arith.cmpi ne, %35, %c0_i32_15 : i32
    scf.if %36 {
      %c0_16 = arith.constant 0 : index
      %c0_17 = arith.constant 0 : index
      %37 = vector.load %arg4[%c0_16, %c0_17] : memref<8x512xf32, #tpu.memory_space<vmem>>, vector<8x512xf32>
      %38 = vector.shape_cast %37 : vector<8x512xf32> to vector<1x8x512xf32>
      %cst_18 = arith.constant dense<0.000000e+00> : vector<1xf32>
      %39 = vector.multi_reduction <add>, %38, %cst_18 [1, 2] : vector<1x8x512xf32> to vector<1xf32>
      %40 = vector.shape_cast %39 : vector<1xf32> to vector<1x1x1xf32>
      %41 = vector.extract %40[0, 0, 0] : f32 from vector<1x1x1xf32>
      %cst_19 = arith.constant 1.600000e+01 : f32
      %42 = arith.divf %41, %cst_19 : f32
      %c0_20 = arith.constant 0 : index
      %c0_21 = arith.constant 0 : index
      %43 = memref.load %arg3[%c0_20, %c0_21] : memref<1x1xf32, #tpu.memory_space<smem>>
      memref.store %42, %arg3[%c0_20, %c0_21] : memref<1x1xf32, #tpu.memory_space<smem>>
    } else {
    }
    return
  }
  func.func @transform_0(%arg0: i32) -> (i32, i32) {
    %c0_i32 = arith.constant 0 : i32
    %c0_i32_0 = arith.constant 0 : i32
    return %arg0, %c0_i32 : i32, i32
  }
  func.func @transform_1(%arg0: i32) -> (i32, i32) {
    %c0_i32 = arith.constant 0 : i32
    %c0_i32_0 = arith.constant 0 : i32
    return %arg0, %c0_i32 : i32, i32
  }
  func.func @transform_2(%arg0: i32) -> (i32, i32) {
    %c0_i32 = arith.constant 0 : i32
    %c0_i32_0 = arith.constant 0 : i32
    %c0_i32_1 = arith.constant 0 : i32
    return %c0_i32, %c0_i32_0 : i32, i32
  }
}

</mosaic_0001>

<bundles_post_ra>
// kernel: tpu_custom_call.1
= control target key start
LH: loop header
LB: loop body
LE: loop exit
PB: predicated region body
PF: predicated region fallthrough
CT: control target
= control target key end

     0   :  { %7 = vsyncpa [#allocation4], 0  ;;  %s289_s0 = inlined_call_operand.hbm [shape: f32[8,512], index: 0, kind: input, shape index: {}]   ;;  %s290_s1 = inlined_call_operand.hbm [shape: f32[8,512], index: 1, kind: input, shape index: {}]   ;;  %s291_s2 = inlined_call_operand.hbm [shape: f32[1,1], index: 2, kind: output, shape index: {}]  }
   0x1   :  { %8 = vsyncpa [#allocation7], 0 }
   0x2   :  { %9 = vsyncpa [#allocation5], 0  ;;  %s235_s9 = smov [#allocation3]   ;;  %s236_s11 = smov [#allocation6]  }
   0x3   :  { %s16_s10 = sshll.u32 %s235_s9, 4  ;;  %s26_s12 = sshll.u32 %s236_s11, 4  ;;  %s17_s10 = int_to_ptr.vmem [resolvable:$true] %s16_s10  ;;  %s27_s12 = int_to_ptr.vmem [resolvable:$true] %s26_s12 }
   0x4   :  { %s175_s15 = scalar_lea.hbm %s289_s0, 512 }
   0x5   :  { %p176_p0 = scmp.ne.s32.totalorder %s289_s0, %s175_s15  ;;  %p179_p1 = scmp.lt.u32.totalorder %s175_s15, %s289_s0 }
   0x7   :  { %p181_p2 = pnand %p179_p1, %p176_p0 }
   0x9   :  { %184 = shalt.err (!%p181_p2)
}
   0xa   :  { %s185_s20 = scalar_lea.vmem %s17_s10, 512  ;;  %p190_p4 = scmp.lt.s32.totalorder %s17_s10, %s17_s10 }
   0xb   :  { %p186_p3 = scmp.ne.s32.totalorder %s17_s10, %s185_s20  ;;  %p191_p5 = scmp.lt.s32.totalorder %s185_s20, %s185_s20 }
   0xd   :  { %p192_p6 = por %p191_p5, %p190_p4 }
   0xf   :  { %p193_p7 = pnand %p192_p6, %p186_p3 }
  0x11   :  { %196 = shalt.err (!%p193_p7)
}
  0x12   :  { %19 = dma.hbm_to_vmem [thread:$0]  %s289_s0, 512, %s17_s10, [#allocation4]  }
  0x13   :  { %s197_s25 = scalar_lea.hbm %s290_s1, 512 }
  0x14   :  { %p198_p8 = scmp.ne.s32.totalorder %s290_s1, %s197_s25  ;;  %p201_p9 = scmp.lt.u32.totalorder %s197_s25, %s290_s1 }
  0x16   :  { %p203_p10 = pnand %p201_p9, %p198_p8 }
  0x18   :  { %206 = shalt.err (!%p203_p10)
}
  0x19   :  { %s207_s30 = scalar_lea.vmem %s27_s12, 512  ;;  %p212_p12 = scmp.lt.s32.totalorder %s27_s12, %s27_s12 }
  0x1a   :  { %p208_p11 = scmp.ne.s32.totalorder %s27_s12, %s207_s30  ;;  %p213_p13 = scmp.lt.s32.totalorder %s207_s30, %s207_s30 }
  0x1c   :  { %p214_p0 = por %p213_p13, %p212_p12 }
  0x1e   :  { %p215_p1 = pnand %p214_p0, %p208_p11 }
  0x20   :  { %218 = shalt.err (!%p215_p1)
}
  0x21   :  { %29 = dma.hbm_to_vmem [thread:$0]  %s290_s1, 512, %s27_s12, [#allocation7]  }
  0x22   :  { %229 = dma.done.wait [#allocation4], 512  }
  0x23   :  { %230 = vsyncadd [#allocation4], 4294966784 }
  0x24   :  { %231 = dma.done.wait [#allocation7], 512  }
  0x25   :  { %232 = vsyncadd [#allocation7], 4294966784  ;;  %v44_v0 = vld [vmem:[#allocation3] sm:$0xff]  ;;  %v45_v1 = vld [vmem:[#allocation3 + $0x8] sm:$0xff]  ;;  %v88_v22 = vlaneseq  ;;  %s219_s7 = scalar_lea.hbm %s291_s2, 16 }
  0x26   :  { %v46_v2 = vld [vmem:[#allocation3 + $0x10] sm:$0xff]  ;;  %v47_v3 = vld [vmem:[#allocation3 + $0x18] sm:$0xff]  ;;  %v48_v4 = vld [vmem:[#allocation6] sm:$0xff]  ;;  %v52_v6 = vmax.f32 %v44_v0, 1.1754944e-38  ;;  %v53_v7 = vmax.f32 %v45_v1, 1.1754944e-38  ;;  %p220_p2 = scmp.ne.s32.totalorder %s291_s2, %s219_s7  ;;  %p223_p3 = scmp.lt.u32.totalorder %s219_s7, %s291_s2 }
  0x27   :  { %v49_v5 = vld [vmem:[#allocation6 + $0x8] sm:$0xff]  ;;  %v54_v8 = vmax.f32 %v46_v2, 1.1754944e-38  ;;  %v50_v9 = vld [vmem:[#allocation6 + $0x10] sm:$0xff]  ;;  %v51_v10 = vld [vmem:[#allocation6 + $0x18] sm:$0xff]  ;;  %v55_v11 = vmax.f32 %v47_v3, 1.1754944e-38  ;;  %v60_v12 = vsub.f32 1.0, %v48_v4 }
  0x28   :  { %v61_v13 = vsub.f32 1.0, %v49_v5  ;;  %v56_v14 = vmin.f32 %v52_v6, 1.0  ;;  %v62_v15 = vsub.f32 1.0, %v50_v9  ;;  %v57_v16 = vmin.f32 %v53_v7, 1.0  ;;  %p225_p4 = pnand %p223_p3, %p220_p2 }
  0x29   :  { %v63_v17 = vsub.f32 1.0, %v51_v10  ;;  %v64_v18 = vmax.f32 %v60_v12, 1.1754944e-38  ;;  %v58_v20 = vmin.f32 %v54_v8, 1.0  ;;  %v59_v23 = vmin.f32 %v55_v11, 1.0 }
  0x2a   :  { %v65_v19 = vmax.f32 %v61_v13, 1.1754944e-38  ;;  %v66_v21 = vmax.f32 %v62_v15, 1.1754944e-38  ;;  %v89_v33 = vshrl.u32 %v88_v22, 7  ;;  %v91_v34 = vand.u32 127, %v88_v22 }
  0x2b   :  { %v67_v24 = vmax.f32 %v63_v17, 1.1754944e-38  ;;  %v68_v25 = vmin.f32 %v64_v18, 1.0 }
  0x2c   :  { %v69_v26 = vmin.f32 %v65_v19, 1.0  ;;  %v70_v27 = vmin.f32 %v66_v21, 1.0  ;;  %v98_v35 = vmul.u32 512, %v89_v33  ;;  %v92_v36 = vadd.s32 128, %v91_v34 }
  0x2d   :  { %v71_v28 = vmin.f32 %v67_v24, 1.0  ;;  %v72_v29 = vmul.f32 %v68_v25, %v56_v14  ;;  %v93_v37 = vadd.s32 256, %v91_v34  ;;  %v94_v38 = vadd.s32 384, %v91_v34 }
  0x2e   :  { %v73_v30 = vmul.f32 %v69_v26, %v57_v16  ;;  %v74_v31 = vmul.f32 %v70_v27, %v58_v20  ;;  %v99_v39 = vadd.s32 %v98_v35, %v91_v34  ;;  %v100_v40 = vadd.s32 %v98_v35, %v92_v36 }
  0x2f   :  { %v75_v32 = vmul.f32 %v71_v28, %v59_v23  ;;  %167 = vlog2.f32 %v72_v29  ;;  %v101_v42 = vadd.s32 %v98_v35, %v93_v37  ;;  %v102_v45 = vadd.s32 %v98_v35, %v94_v38 }
  0x30   :  { %169 = vlog2.f32 %v73_v30  ;;  %vm103_vm0 = vcmp.lt.s32.totalorder %v99_v39, 16  ;;  %vm104_vm1 = vcmp.lt.s32.totalorder %v100_v40, 16 }
  0x31   :  { %171 = vlog2.f32 %v74_v31  ;;  %vm105_vm2 = vcmp.lt.s32.totalorder %v101_v42, 16  ;;  %vm106_vm3 = vcmp.lt.s32.totalorder %v102_v45, 16 }
  0x32   :  { %173 = vlog2.f32 %v75_v32 }
  0x39   :  { %v168_v41 = vpop.eup %167 }
  0x3a   :  { %v170_v43 = vpop.eup %169  ;;  %v77_v44 = vmul.f32 0.6931472, %v168_v41 }
  0x3b   :  { %v172_v46 = vpop.eup %171  ;;  %v79_v47 = vmul.f32 0.6931472, %v170_v43 }
  0x3c   :  { %v174_v48 = vpop.eup %173  ;;  %v81_v49 = vmul.f32 0.6931472, %v172_v46  ;;  %v84_v50 = vsub.f32 0.0, %v77_v44 }
  0x3d   :  { %v83_v51 = vmul.f32 0.6931472, %v174_v48  ;;  %v85_v52 = vsub.f32 0.0, %v79_v47 }
  0x3e   :  { %v86_v53 = vsub.f32 0.0, %v81_v49  ;;  %v107_v54 = vsel %vm103_vm0, %v84_v50, 0.0 }
  0x3f   :  { %v87_v55 = vsub.f32 0.0, %v83_v51  ;;  %v108_v56 = vsel %vm104_vm1, %v85_v52, 0.0 }
  0x40   :  { %v109_v57 = vsel %vm105_vm2, %v86_v53, 0.0  ;;  %v130_v58 = vadd.f32 %v108_v56, %v107_v54 }
  0x41   :  { %v110_v59 = vsel %vm106_vm3, %v87_v55, 0.0 }
  0x42   :  { %v131_v60 = vadd.f32 %v130_v58, %v109_v57 }
  0x44   :  { %v132_v61 = vadd.f32 %v131_v60, %v110_v59 }
  0x46   :  { %133 = vadd.xlane.f32.xlu0 %v132_v61 }
  0xd3   :  { %v134_v62 = vpop.xlane.xlu0 %133 }
  0xd4   :  { %v135_v63 = vrot.slane %v134_v62, 4 }
  0xd6   :  { %v136_v0 = vadd.f32 %v135_v63, %v134_v62 }
  0xd8   :  { %v137_v1 = vrot.slane %v136_v0, 2 }
  0xda   :  { %v138_v2 = vadd.f32 %v137_v1, %v136_v0 }
  0xdc   :  { %v139_v3 = vrot.slane %v138_v2, 1 }
  0xde   :  { %v140_v4 = vadd.f32 %v139_v3, %v138_v2 }
  0xe0   :  { %162 = vpush %v140_v4 }
 0x111   :  { %s163_s1 = spop %162 }
 0x112   :  { %s144_s4 = smul.f32 0.0625, %s163_s1 }
 0x114   :  { %146 = sst [smem:[#allocation8]] %s144_s4 }
 0x115   :  { %228 = shalt.err (!%p225_p4)
}
 0x116   :  { %s237_s12 = smov [#allocation8]  }
 0x117   :  { %154 = dma.smem_to_hbm %s237_s12, 16, %s291_s2, [#allocation5]  }
 0x118   :  { %233 = dma.done.wait [#allocation5], 16  }
 0x119   :  { %234 = vsyncadd [#allocation5], 4294967280 }
 0x11a   :  { %158 = sfence }
 0x11b   :  { %159 = vsyncpa [#allocation4], 1 }
 0x11c   :  { %160 = vsyncpa [#allocation7], 1 }
 0x11d   :  { %161 = vsyncpa [#allocation5], 1 }

</bundles_post_ra>
